<compile_context>
chip_gen: v5e
topology: v5e:2x2
jax: 0.10.0
libtpu: 0.0.40
codegen_flags: <defaults>
</compile_context>

<pallas_src>
import numpy as np
import jax
import jax.numpy as jnp
from jax import lax
from jax.experimental import pallas as pl
from jax.experimental.pallas import tpu as pltpu

EPS = 1e-5


# --------------------------------------------------------------------------- #
# Kernels
# --------------------------------------------------------------------------- #
def _conv3x3_im2col(src_pad_ref, w_ref, col_ref):
    """3x3 'same' conv of an already zero-padded source via one im2col matmul.

    src_pad_ref : (TB, H+2, W+2, C)  zero-padded activations (VMEM)
    w_ref       : (9*C, C)           weights, row index = (di*3 + dj)*C + ci
    col_ref     : (TB, H, W, 9*C)    VMEM scratch holding the patch slab
    returns     : (TB*H*W, C) float32
    """
    TB, H2, W2, C = src_pad_ref.shape
    H, W = H2 - 2, W2 - 2
    # Build the im2col slab with 9 direct strided stores (no lane-dim concat,
    # no per-tap reshape copies).
    for t in range(9):
        di, dj = t // 3, t % 3
        col_ref[:, :, :, t * C:(t + 1) * C] = src_pad_ref[:, di:di + H, dj:dj + W, :]
    col = col_ref[...].reshape(TB * H * W, 9 * C)
    # Single MXU matmul with K = 9*C; operands cast to the weight dtype
    # (bf16 on v6e/v7x when use_bf16_mxu=True), f32 accumulation.
    return jnp.dot(col.astype(w_ref.dtype), w_ref[...],
                   preferred_element_type=jnp.float32)


def _store_stats(y, st_ref):
    """Per-tile partial BN statistics: row 0 = sum, row 1 = sum of squares."""
    s1 = jnp.sum(y, axis=0, keepdims=True)
    s2 = jnp.sum(y * y, axis=0, keepdims=True)
    st_ref[...] = jnp.concatenate([s1, s2], axis=0).reshape(st_ref.shape)


def _conv1_kernel(xpad_ref, w_ref, y_ref, st_ref, col_ref):
    TB, H, W, C = y_ref.shape
    y = _conv3x3_im2col(xpad_ref, w_ref, col_ref)          # (TB*H*W, C) f32
    y_ref[...] = y.reshape(TB, H, W, C)
    _store_stats(y, st_ref)


def _conv2_kernel(y1_ref, ss_ref, w_ref, y2_ref, st_ref, pad_ref, col_ref):
    TB, H, W, C = y1_ref.shape
    # BN1 apply (scale/shift precomputed in the wrapper from pass-1 stats) + ReLU.
    a = jnp.maximum(y1_ref[...] * ss_ref[0:1, :] + ss_ref[1:2, :], 0.0)
    # Zero only the 1-pixel halo; the interior is fully overwritten below.
    # Zeroed every step on purpose: with "parallel" grid semantics each core owns
    # a private scratch and may never execute step 0, so a pl.when(step==0) gate
    # would be unsafe.
    pad_ref[:, 0:1, :, :] = jnp.zeros((TB, 1, W + 2, C), jnp.float32)
    pad_ref[:, H + 1:H + 2, :, :] = jnp.zeros((TB, 1, W + 2, C), jnp.float32)
    pad_ref[:, :, 0:1, :] = jnp.zeros((TB, H + 2, 1, C), jnp.float32)
    pad_ref[:, :, W + 1:W + 2, :] = jnp.zeros((TB, H + 2, 1, C), jnp.float32)
    # TODO(synk): this interior store is lane-misaligned when C % 128 != 0
    # (a (W*C)-packed pad layout would fix it); kept for clarity.
    pad_ref[:, 1:H + 1, 1:W + 1, :] = a
    y = _conv3x3_im2col(pad_ref, w_ref, col_ref)
    y2_ref[...] = y.reshape(TB, H, W, C)
    _store_stats(y, st_ref)


def _finish_kernel(y2_ref, x_ref, ss_ref, o_ref):
    # Lane-dense (TB, H, W*C) view: BN2 apply + residual + ReLU, unmasked store.
    o_ref[...] = jnp.maximum(
        y2_ref[...] * ss_ref[0:1, :] + ss_ref[1:2, :] + x_ref[...], 0.0)


# --------------------------------------------------------------------------- #
# Wrapper
# --------------------------------------------------------------------------- #
def _vmem_capacity_bytes():
    try:
        return int(pltpu.get_tpu_info().vmem_capacity_bytes)
    except Exception:            # hardware-info query only; fall back to v7x floor
        return 64 * 2 ** 20


def _pick_batch_tile(N, H, W, C, budget_bytes):
    """Largest batch tile whose per-step VMEM footprint fits the budget, capped
    at N//2 so the grid has >= 2 steps (v7x megacore + DMA/compute pipelining)."""
    def tile_bytes(tb):
        io = 2 * (2 * tb * H * W * C + 9 * C * C + 4 * C)        # dbl-buffered windows
        scr = tb * (H + 2) * (W + 2) * C + tb * H * W * 9 * C    # pad + im2col scratch
        return 4 * (io + scr)
    for d in range(max(1, N // 2), 0, -1):
        if N % d == 0 and tile_bytes(d) <= budget_bytes:
            return d
    return 1


def _bn_scale_shift(partial_stats, gamma, beta, count):
    """Fold training-mode BN (batch statistics) into per-channel scale/shift."""
    s = jnp.sum(partial_stats, axis=0)                    # (2, C)
    mean = s[0] / count
    var = jnp.maximum(s[1] / count - mean * mean, 0.0)    # clamp: cancellation guard
    scale = gamma / jnp.sqrt(var + EPS)
    shift = beta - mean * scale
    return scale, shift


def block_forward(x_nchw, params, *, use_bf16_mxu=False):
    """Pallas version of Block.forward (training-mode BatchNorm).

    x_nchw : (N, C, H, W) float32.
    use_bf16_mxu : cast matmul operands to bf16 (v6e/v7x MXU fast path),
                   accumulation stays float32.
    """
    w1, b1, g1, bt1, w2, b2, g2, bt2 = params
    del b1, b2   # conv bias before training-mode BN cancels exactly (dead add)
    N, C, H, W = x_nchw.shape
    M = N * H * W
    mxu_dtype = jnp.bfloat16 if use_bf16_mxu else jnp.float32

    x = jnp.transpose(x_nchw, (0, 2, 3, 1))                       # NCHW -> NHWC
    x_pad = jnp.pad(x, ((0, 0), (1, 1), (1, 1), (0, 0)))          # pad1 done by XLA
    # OIHW -> HWIO -> (9*Cin, Cout); row index = (di*3 + dj)*Cin + ci
    w1_k = jnp.transpose(w1, (2, 3, 1, 0)).reshape(9 * C, C).astype(mxu_dtype)
    w2_k = jnp.transpose(w2, (2, 3, 1, 0)).reshape(9 * C, C).astype(mxu_dtype)

    # Generation-aware VMEM budget (v5e/v6e: ~96 MiB of 128, v7x: ~48 MiB of 64).
    vmem_cap = _vmem_capacity_bytes()
    vmem_limit = int(min(int(0.75 * vmem_cap), 100 * 2 ** 20))
    TB = _pick_batch_tile(N, H, W, C, vmem_limit // 2)
    G = N // TB
    # TODO(synk): very large per-image H*W*C would additionally need spatial (row)
    # tiling with a 1-row halo; unnecessary for Go-board-sized inputs.

    cparams = pltpu.CompilerParams(dimension_semantics=("parallel",),
                                   vmem_limit_bytes=vmem_limit)
    conv_cost = pl.CostEstimate(
        flops=int(2 * M * 9 * C * C + 6 * M * C),
        transcendentals=0,
        bytes_accessed=int(4 * (N * (H + 2) * (W + 2) * C + M * C
                                + 9 * C * C + 2 * C * G + 2 * C)))

    # ---- pass 1: conv1 + per-tile BN1 partial sums ---------------------------
    y1, st1 = pl.pallas_call(
        _conv1_kernel,
        grid=(G,),
        in_specs=[pl.BlockSpec((TB, H + 2, W + 2, C), lambda b: (b, 0, 0, 0)),
                  pl.BlockSpec((9 * C, C), lambda b: (0, 0))],
        out_specs=(pl.BlockSpec((TB, H, W, C), lambda b: (b, 0, 0, 0)),
                   pl.BlockSpec((1, 2, C), lambda b: (b, 0, 0))),
        out_shape=(jax.ShapeDtypeStruct((N, H, W, C), jnp.float32),
                   jax.ShapeDtypeStruct((G, 2, C), jnp.float32)),
        scratch_shapes=[pltpu.VMEM((TB, H, W, 9 * C), jnp.float32)],
        compiler_params=cparams,
        cost_estimate=conv_cost,
    )(x_pad, w1_k)

    scale1, shift1 = _bn_scale_shift(st1, g1, bt1, M)
    ss1 = jnp.stack([scale1, shift1])                             # (2, C)

    # ---- pass 2: BN1 apply + ReLU + pad + conv2 + BN2 partial sums -----------
    y2, st2 = pl.pallas_call(
        _conv2_kernel,
        grid=(G,),
        in_specs=[pl.BlockSpec((TB, H, W, C), lambda b: (b, 0, 0, 0)),
                  pl.BlockSpec((2, C), lambda b: (0, 0)),
                  pl.BlockSpec((9 * C, C), lambda b: (0, 0))],
        out_specs=(pl.BlockSpec((TB, H, W, C), lambda b: (b, 0, 0, 0)),
                   pl.BlockSpec((1, 2, C), lambda b: (b, 0, 0))),
        out_shape=(jax.ShapeDtypeStruct((N, H, W, C), jnp.float32),
                   jax.ShapeDtypeStruct((G, 2, C), jnp.float32)),
        scratch_shapes=[pltpu.VMEM((TB, H + 2, W + 2, C), jnp.float32),
                        pltpu.VMEM((TB, H, W, 9 * C), jnp.float32)],
        compiler_params=cparams,
        cost_estimate=conv_cost,
    )(y1, ss1, w2_k)

    scale2, shift2 = _bn_scale_shift(st2, g2, bt2, M)
    # Pre-tile the per-channel affine to W*C lanes for the lane-dense final pass.
    ss2 = jnp.stack([jnp.tile(scale2, W), jnp.tile(shift2, W)])   # (2, W*C)

    # ---- pass 3: BN2 apply + residual + ReLU on a lane-dense view ------------
    out = pl.pallas_call(
        _finish_kernel,
        grid=(G,),
        in_specs=[pl.BlockSpec((TB, H, W * C), lambda b: (b, 0, 0)),
                  pl.BlockSpec((TB, H, W * C), lambda b: (b, 0, 0)),
                  pl.BlockSpec((2, W * C), lambda b: (0, 0))],
        out_specs=pl.BlockSpec((TB, H, W * C), lambda b: (b, 0, 0)),
        out_shape=jax.ShapeDtypeStruct((N, H, W * C), jnp.float32),
        compiler_params=cparams,
    )(y2.reshape(N, H, W * C), x.reshape(N, H, W * C), ss2)

    return jnp.transpose(out.reshape(N, H, W, C), (0, 3, 1, 2))   # NHWC -> NCHW


# --------------------------------------------------------------------------- #
# Pure-JAX reference (mirrors the PyTorch forward, training-mode BN)
# --------------------------------------------------------------------------- #
def block_ref(x, params):
    w1, b1, g1, bt1, w2, b2, g2, bt2 = params

    def conv(y, w, b):
        z = lax.conv_general_dilated(y, w, (1, 1), [(1, 1), (1, 1)],
                                     dimension_numbers=('NCHW', 'OIHW', 'NCHW'))
        return z + b[None, :, None, None]

    def bn(y, g, bt):
        mean = jnp.mean(y, axis=(0, 2, 3), keepdims=True)
        var = jnp.mean((y - mean) ** 2, axis=(0, 2, 3), keepdims=True)
        return (g[None, :, None, None] * (y - mean) / jnp.sqrt(var + EPS)
                + bt[None, :, None, None])

    out = jax.nn.relu(bn(conv(x, w1, b1), g1, bt1))
    out = bn(conv(out, w2, b2), g2, bt2) + x
    return jax.nn.relu(out)


def init_params(key, num_channel):
    """Deterministic parameter init (shapes per Block.__init__)."""
    k1, k2, k3, k4 = jax.random.split(key, 4)
    fan_in = num_channel * 3 * 3
    bound = 1.0 / np.sqrt(fan_in)
    w1 = jax.random.uniform(k1, (num_channel, num_channel, 3, 3),
                            jnp.float32, -bound, bound)
    b1 = jax.random.uniform(k2, (num_channel,), jnp.float32, -bound, bound)
    w2 = jax.random.uniform(k3, (num_channel, num_channel, 3, 3),
                            jnp.float32, -bound, bound)
    b2 = jax.random.uniform(k4, (num_channel,), jnp.float32, -bound, bound)
    g1 = jnp.ones((num_channel,), jnp.float32)
    bt1 = jnp.zeros((num_channel,), jnp.float32)
    g2 = jnp.ones((num_channel,), jnp.float32)
    bt2 = jnp.zeros((num_channel,), jnp.float32)
    return (w1, b1, g1, bt1, w2, b2, g2, bt2)


if __name__ == "__main__":
    N, C, H, W = 2, 8, 8, 8
    key = jax.random.PRNGKey(0)
    kx, kp = jax.random.split(key)
    x = jax.random.normal(kx, (N, C, H, W), jnp.float32)
    params = init_params(kp, C)

    ref = jax.block_until_ready(block_ref(x, params))

    # Exact-semantics (f32 MXU) path: strict check.
    out = jax.block_until_ready(block_forward(x, params, use_bf16_mxu=False))
    np.testing.assert_allclose(np.asarray(out), np.asarray(ref),
                               rtol=1e-4, atol=1e-4)

    # bf16-MXU fast path (v6e/v7x): f32 accumulation, looser tolerance.
    out_bf16 = jax.block_until_ready(block_forward(x, params, use_bf16_mxu=True))
    np.testing.assert_allclose(np.asarray(out_bf16), np.asarray(ref),
                               rtol=5e-2, atol=1e-1)

    assert out.shape == (N, C, H, W)
    print("KERNEL_OK")
</pallas_src>

<mosaic_0001>
module attributes {stable_mosaic.version = 11 : i64} {
  func.func @_conv1_kernel(%arg0: i32, %arg1: memref<1x10x10x8xf32, #tpu.memory_space<vmem>>, %arg2: memref<72x8xf32, #tpu.memory_space<vmem>>, %arg3: memref<1x8x8x8xf32, #tpu.memory_space<vmem>>, %arg4: memref<1x2x8xf32, #tpu.memory_space<vmem>>, %arg5: memref<1x8x8x72xf32, #tpu.memory_space<vmem>>) attributes {dimension_semantics = [#tpu.dimension_semantics<parallel>], iteration_bounds = array<i64: 2>, scalar_prefetch = 0 : i64, scratch_operands = 1 : i64, tpu.core_type = #tpu.core_type<tc>, window_params = [{transform_indices = @transform_0, window_bounds = array<i64: 1, 10, 10, 8>}, {pipeline_mode = #tpu.pipeline_mode<synchronous>, transform_indices = @transform_1, window_bounds = array<i64: 72, 8>}, {transform_indices = @transform_2, window_bounds = array<i64: 1, 8, 8, 8>}, {transform_indices = @transform_3, window_bounds = array<i64: 1, 2, 8>}]} {
    %c0 = arith.constant 0 : index
    %c0_0 = arith.constant 0 : index
    %c0_1 = arith.constant 0 : index
    %c0_2 = arith.constant 0 : index
    %0 = vector.load %arg1[%c0, %c0_0, %c0_1, %c0_2] : memref<1x10x10x8xf32, #tpu.memory_space<vmem>>, vector<1x8x8x8xf32>
    %c0_3 = arith.constant 0 : index
    %c0_4 = arith.constant 0 : index
    %c0_5 = arith.constant 0 : index
    %c0_6 = arith.constant 0 : index
    %1 = vector.load %arg5[%c0_3, %c0_4, %c0_5, %c0_6] : memref<1x8x8x72xf32, #tpu.memory_space<vmem>>, vector<1x8x8x8xf32>
    tpu.vector_store %arg5[%c0_3, %c0_4, %c0_5, %c0_6], %0 {strides = array<i32>} : memref<1x8x8x72xf32, #tpu.memory_space<vmem>>, vector<1x8x8x8xf32>,
    %c0_7 = arith.constant 0 : index
    %c0_8 = arith.constant 0 : index
    %c1 = arith.constant 1 : index
    %c0_9 = arith.constant 0 : index
    %2 = vector.load %arg1[%c0_7, %c0_8, %c1, %c0_9] : memref<1x10x10x8xf32, #tpu.memory_space<vmem>>, vector<1x8x8x8xf32>
    %c0_10 = arith.constant 0 : index
    %c0_11 = arith.constant 0 : index
    %c0_12 = arith.constant 0 : index
    %c8 = arith.constant 8 : index
    %3 = vector.load %arg5[%c0_10, %c0_11, %c0_12, %c8] : memref<1x8x8x72xf32, #tpu.memory_space<vmem>>, vector<1x8x8x8xf32>
    tpu.vector_store %arg5[%c0_10, %c0_11, %c0_12, %c8], %2 {strides = array<i32>} : memref<1x8x8x72xf32, #tpu.memory_space<vmem>>, vector<1x8x8x8xf32>,
    %c0_13 = arith.constant 0 : index
    %c0_14 = arith.constant 0 : index
    %c2 = arith.constant 2 : index
    %c0_15 = arith.constant 0 : index
    %4 = vector.load %arg1[%c0_13, %c0_14, %c2, %c0_15] : memref<1x10x10x8xf32, #tpu.memory_space<vmem>>, vector<1x8x8x8xf32>
    %c0_16 = arith.constant 0 : index
    %c0_17 = arith.constant 0 : index
    %c0_18 = arith.constant 0 : index
    %c16 = arith.constant 16 : index
    %5 = vector.load %arg5[%c0_16, %c0_17, %c0_18, %c16] : memref<1x8x8x72xf32, #tpu.memory_space<vmem>>, vector<1x8x8x8xf32>
    tpu.vector_store %arg5[%c0_16, %c0_17, %c0_18, %c16], %4 {strides = array<i32>} : memref<1x8x8x72xf32, #tpu.memory_space<vmem>>, vector<1x8x8x8xf32>,
    %c0_19 = arith.constant 0 : index
    %c1_20 = arith.constant 1 : index
    %c0_21 = arith.constant 0 : index
    %c0_22 = arith.constant 0 : index
    %6 = vector.load %arg1[%c0_19, %c1_20, %c0_21, %c0_22] : memref<1x10x10x8xf32, #tpu.memory_space<vmem>>, vector<1x8x8x8xf32>
    %c0_23 = arith.constant 0 : index
    %c0_24 = arith.constant 0 : index
    %c0_25 = arith.constant 0 : index
    %c24 = arith.constant 24 : index
    %7 = vector.load %arg5[%c0_23, %c0_24, %c0_25, %c24] : memref<1x8x8x72xf32, #tpu.memory_space<vmem>>, vector<1x8x8x8xf32>
    tpu.vector_store %arg5[%c0_23, %c0_24, %c0_25, %c24], %6 {strides = array<i32>} : memref<1x8x8x72xf32, #tpu.memory_space<vmem>>, vector<1x8x8x8xf32>,
    %c0_26 = arith.constant 0 : index
    %c1_27 = arith.constant 1 : index
    %c1_28 = arith.constant 1 : index
    %c0_29 = arith.constant 0 : index
    %8 = vector.load %arg1[%c0_26, %c1_27, %c1_28, %c0_29] : memref<1x10x10x8xf32, #tpu.memory_space<vmem>>, vector<1x8x8x8xf32>
    %c0_30 = arith.constant 0 : index
    %c0_31 = arith.constant 0 : index
    %c0_32 = arith.constant 0 : index
    %c32 = arith.constant 32 : index
    %9 = vector.load %arg5[%c0_30, %c0_31, %c0_32, %c32] : memref<1x8x8x72xf32, #tpu.memory_space<vmem>>, vector<1x8x8x8xf32>
    tpu.vector_store %arg5[%c0_30, %c0_31, %c0_32, %c32], %8 {strides = array<i32>} : memref<1x8x8x72xf32, #tpu.memory_space<vmem>>, vector<1x8x8x8xf32>,
    %c0_33 = arith.constant 0 : index
    %c1_34 = arith.constant 1 : index
    %c2_35 = arith.constant 2 : index
    %c0_36 = arith.constant 0 : index
    %10 = vector.load %arg1[%c0_33, %c1_34, %c2_35, %c0_36] : memref<1x10x10x8xf32, #tpu.memory_space<vmem>>, vector<1x8x8x8xf32>
    %c0_37 = arith.constant 0 : index
    %c0_38 = arith.constant 0 : index
    %c0_39 = arith.constant 0 : index
    %c40 = arith.constant 40 : index
    %11 = vector.load %arg5[%c0_37, %c0_38, %c0_39, %c40] : memref<1x8x8x72xf32, #tpu.memory_space<vmem>>, vector<1x8x8x8xf32>
    tpu.vector_store %arg5[%c0_37, %c0_38, %c0_39, %c40], %10 {strides = array<i32>} : memref<1x8x8x72xf32, #tpu.memory_space<vmem>>, vector<1x8x8x8xf32>,
    %c0_40 = arith.constant 0 : index
    %c2_41 = arith.constant 2 : index
    %c0_42 = arith.constant 0 : index
    %c0_43 = arith.constant 0 : index
    %12 = vector.load %arg1[%c0_40, %c2_41, %c0_42, %c0_43] : memref<1x10x10x8xf32, #tpu.memory_space<vmem>>, vector<1x8x8x8xf32>
    %c0_44 = arith.constant 0 : index
    %c0_45 = arith.constant 0 : index
    %c0_46 = arith.constant 0 : index
    %c48 = arith.constant 48 : index
    %13 = vector.load %arg5[%c0_44, %c0_45, %c0_46, %c48] : memref<1x8x8x72xf32, #tpu.memory_space<vmem>>, vector<1x8x8x8xf32>
    tpu.vector_store %arg5[%c0_44, %c0_45, %c0_46, %c48], %12 {strides = array<i32>} : memref<1x8x8x72xf32, #tpu.memory_space<vmem>>, vector<1x8x8x8xf32>,
    %c0_47 = arith.constant 0 : index
    %c2_48 = arith.constant 2 : index
    %c1_49 = arith.constant 1 : index
    %c0_50 = arith.constant 0 : index
    %14 = vector.load %arg1[%c0_47, %c2_48, %c1_49, %c0_50] : memref<1x10x10x8xf32, #tpu.memory_space<vmem>>, vector<1x8x8x8xf32>
    %c0_51 = arith.constant 0 : index
    %c0_52 = arith.constant 0 : index
    %c0_53 = arith.constant 0 : index
    %c56 = arith.constant 56 : index
    %15 = vector.load %arg5[%c0_51, %c0_52, %c0_53, %c56] : memref<1x8x8x72xf32, #tpu.memory_space<vmem>>, vector<1x8x8x8xf32>
    tpu.vector_store %arg5[%c0_51, %c0_52, %c0_53, %c56], %14 {strides = array<i32>} : memref<1x8x8x72xf32, #tpu.memory_space<vmem>>, vector<1x8x8x8xf32>,
    %c0_54 = arith.constant 0 : index
    %c2_55 = arith.constant 2 : index
    %c2_56 = arith.constant 2 : index
    %c0_57 = arith.constant 0 : index
    %16 = vector.load %arg1[%c0_54, %c2_55, %c2_56, %c0_57] : memref<1x10x10x8xf32, #tpu.memory_space<vmem>>, vector<1x8x8x8xf32>
    %c0_58 = arith.constant 0 : index
    %c0_59 = arith.constant 0 : index
    %c0_60 = arith.constant 0 : index
    %c64 = arith.constant 64 : index
    %17 = vector.load %arg5[%c0_58, %c0_59, %c0_60, %c64] : memref<1x8x8x72xf32, #tpu.memory_space<vmem>>, vector<1x8x8x8xf32>
    tpu.vector_store %arg5[%c0_58, %c0_59, %c0_60, %c64], %16 {strides = array<i32>} : memref<1x8x8x72xf32, #tpu.memory_space<vmem>>, vector<1x8x8x8xf32>,
    %c0_61 = arith.constant 0 : index
    %c0_62 = arith.constant 0 : index
    %c0_63 = arith.constant 0 : index
    %c0_64 = arith.constant 0 : index
    %18 = vector.load %arg5[%c0_61, %c0_62, %c0_63, %c0_64] : memref<1x8x8x72xf32, #tpu.memory_space<vmem>>, vector<1x8x8x72xf32>
    %19 = vector.shape_cast %18 : vector<1x8x8x72xf32> to vector<64x72xf32>
    %c0_65 = arith.constant 0 : index
    %c0_66 = arith.constant 0 : index
    %20 = vector.load %arg2[%c0_65, %c0_66] : memref<72x8xf32, #tpu.memory_space<vmem>>, vector<72x8xf32>
    %cst = arith.constant dense<0.000000e+00> : vector<64x8xf32>
    %21 = tpu.matmul %19, %20, %cst {dimension_numbers = #tpu.dot_dimension_numbers<[1], [0], [0], [1], [0, 0, 1, 1], [], []>} : vector<64x72xf32>, vector<72x8xf32>, vector<64x8xf32> -> vector<64x8xf32>
    %22 = vector.shape_cast %21 : vector<64x8xf32> to vector<1x8x8x8xf32>
    %c0_67 = arith.constant 0 : index
    %c0_68 = arith.constant 0 : index
    %c0_69 = arith.constant 0 : index
    %c0_70 = arith.constant 0 : index
    %23 = vector.load %arg3[%c0_67, %c0_68, %c0_69, %c0_70] : memref<1x8x8x8xf32, #tpu.memory_space<vmem>>, vector<1x8x8x8xf32>
    tpu.vector_store %arg3[%c0_67, %c0_68, %c0_69, %c0_70], %22 {strides = array<i32>} : memref<1x8x8x8xf32, #tpu.memory_space<vmem>>, vector<1x8x8x8xf32>,
    %cst_71 = arith.constant dense<0.000000e+00> : vector<8xf32>
    %24 = vector.multi_reduction <add>, %21, %cst_71 [0] : vector<64x8xf32> to vector<8xf32>
    %25 = vector.shape_cast %24 : vector<8xf32> to vector<1x8xf32>
    %26 = arith.mulf %21, %21 : vector<64x8xf32>
    %cst_72 = arith.constant dense<0.000000e+00> : vector<8xf32>
    %27 = vector.multi_reduction <add>, %26, %cst_72 [0] : vector<64x8xf32> to vector<8xf32>
    %28 = vector.shape_cast %27 : vector<8xf32> to vector<1x8xf32>
    %29 = tpu.concatenate %25, %28 in 0 : vector<1x8xf32>, vector<1x8xf32> -> vector<2x8xf32>
    %30 = vector.shape_cast %29 : vector<2x8xf32> to vector<1x2x8xf32>
    %c0_73 = arith.constant 0 : index
    %c0_74 = arith.constant 0 : index
    %c0_75 = arith.constant 0 : index
    %31 = vector.load %arg4[%c0_73, %c0_74, %c0_75] : memref<1x2x8xf32, #tpu.memory_space<vmem>>, vector<1x2x8xf32>
    tpu.vector_store %arg4[%c0_73, %c0_74, %c0_75], %30 {strides = array<i32>} : memref<1x2x8xf32, #tpu.memory_space<vmem>>, vector<1x2x8xf32>,
    return
  }
  func.func @transform_0(%arg0: i32) -> (i32, i32, i32, i32) {
    %c0_i32 = arith.constant 0 : i32
    %c0_i32_0 = arith.constant 0 : i32
    %c0_i32_1 = arith.constant 0 : i32
    %c0_i32_2 = arith.constant 0 : i32
    return %arg0, %c0_i32, %c0_i32_0, %c0_i32_1 : i32, i32, i32, i32
  }
  func.func @transform_1(%arg0: i32) -> (i32, i32) {
    %c0_i32 = arith.constant 0 : i32
    %c0_i32_0 = arith.constant 0 : i32
    %c0_i32_1 = arith.constant 0 : i32
    return %c0_i32, %c0_i32_0 : i32, i32
  }
  func.func @transform_2(%arg0: i32) -> (i32, i32, i32, i32) {
    %c0_i32 = arith.constant 0 : i32
    %c0_i32_0 = arith.constant 0 : i32
    %c0_i32_1 = arith.constant 0 : i32
    %c0_i32_2 = arith.constant 0 : i32
    return %arg0, %c0_i32, %c0_i32_0, %c0_i32_1 : i32, i32, i32, i32
  }
  func.func @transform_3(%arg0: i32) -> (i32, i32, i32) {
    %c0_i32 = arith.constant 0 : i32
    %c0_i32_0 = arith.constant 0 : i32
    %c0_i32_1 = arith.constant 0 : i32
    return %arg0, %c0_i32, %c0_i32_0 : i32, i32, i32
  }
}

</mosaic_0001>

<bundles_post_ra>
// kernel: tpu_custom_call.1
= control target key start
LH: loop header
LB: loop body
LE: loop exit
PB: predicated region body
PF: predicated region fallthrough
CT: control target
= control target key end

     0   :  { %9 = vsyncpa [#allocation4], 0  ;;  %s1561_s0 = inlined_call_operand.vmem [shape: f32[2,10,10,8], index: 0, kind: input, shape index: {}]   ;;  %s1562_s1 = inlined_call_operand.vmem [shape: f32[72,8], index: 1, kind: input, shape index: {}]   ;;  %s1563_s2 = inlined_call_operand.hbm [shape: f32[2,8,8,8], index: 2, kind: output, shape index: {0}]   ;;  %s1564_s3 = inlined_call_operand.hbm [shape: f32[2,2,8], index: 3, kind: output, shape index: {1}]  }
   0x1   :  { %11 = vsyncpa [#allocation4 + $0x1], 0 }
   0x2   :  { %12 = vsyncpa [#allocation6], 0 }
   0x3   :  { %14 = vsyncpa [#allocation6 + $0x1], 0  ;;  %s1143_s12 = smov 0   ;;  %s1145_s13 = smov 0  }
   0x4   :  { %s1147_s14 = smov 0   ;;  %s1149_s15 = smov 0  }
   0x5 LB: > { %s1164_s16 = sadd.s32 4294967295, %s1112_s15   ;;  %s866_s17 = sadd.s32 4294967294, %s1112_s15   ;;  %s1112_s15 = sphi %s1149_s15, %s1570_s15   ;;  %s1108_s14 = sphi %s1147_s14, %s1569_s14   ;;  %s1104_s13 = sphi %s1145_s13, %s1568_s13   ;;  %s1100_s12 = sphi %s1143_s12, %s1567_s12  }
   0x6   : > { %s1168_s18 = sadd.s32 1, %s1112_s15   ;;  %s74_s19 = sadd.s32 1, %s1108_s14 }
   0x7   : > { %s71_s20 = ssub.s32 %s1112_s15, %s1168_s18  ;;  %p84_p0 = scmp.ne.s32.totalorder %s1108_s14, %s1104_s13 }
   0x8   : > { %p72_p1 = scmp.eq.s32.totalorder %s71_s20, 0  ;;  %p85_p2 = scmp.eq.s32.totalorder %s1164_s16, 1 }
   0x9   : > { %p90_p3 = scmp.ne.s32.totalorder %s1104_s13, %s1100_s12  ;;  %p91_p4 = scmp.eq.s32.totalorder %s866_s17, 1 }
   0xa   : > { %s1179_s21 = scalar_select %p72_p1, %s1108_s14, %s74_s19  }
   0xb   : > { %p1181_p5 = por %p85_p2, %p84_p0  ;;  %p1185_p6 = por %p91_p4, %p90_p3 }
   0xc   : > { %p869_p7 = scmp.ge.s32.totalorder %s1112_s15, 1  ;;  %p146_p8 = scmp.lt.s32.totalorder %s1112_s15, 3 }
   0xe   : > { %p147_p9 = pnand %p869_p7, %p146_p8 }
   0xf   : > { %p175_p10 = scmp.lt.s32.totalorder (!%p147_p9), %s1164_s16, 1  ;;  %s1114_s29 = smov (!%p147_p9), 8  }
  0x10   : > { %150 = sbr.rel (%p147_p9) target bundleno = 473 (0x1d9), region = 28  ;;  %s1115_s30 = smov (!%p147_p9), 16  }
  0x11   : > { %s1116_s4 = smov (!%p147_p9), 24   ;;  %s1117_s5 = smov (!%p147_p9), 32  }
  0x12   : > { %s1118_s6 = smov (!%p147_p9), 40   ;;  %s1119_s7 = smov (!%p147_p9), 48  }
  0x13   : > { %s1120_s8 = smov (!%p147_p9), 56   ;;  %s1121_s9 = smov (!%p147_p9), 64  }
  0x14   : > { %s1038_s20 = scalar_lea.hbm (!%p147_p9), %s1563_s2, 128 }
  0x15   : > { %s176_s24 = scalar_select %p175_p10, %s1164_s16, 1  ;;  %vm188_vm0 = vcmask 64512   ;;  %vm237_vm1 = vcmask 130112   ;;  %vm286_vm2 = vcmask 195712   ;;  %vm336_vm3 = vcmask 261312   ;;  %v607_v35 = vld [vmem:[%s1562_s1 + $0x40] sm:$0xff] }
  0x16   : > { %vm385_vm4 = vcmask 326912   ;;  %vm434_vm5 = vcmask 392512   ;;  %vm484_vm6 = vcmask 458112   ;;  %640 = vmatpush.msra.mxu0 %v607_v35  ;;  %938 = vmatpush.msra.mxu2 %v607_v35  ;;  %v606_v37 = vld [vmem:[%s1562_s1 + $0x38] sm:$0xff]  ;;  %v605_v40 = vld [vmem:[%s1562_s1 + $0x30] sm:$0xff]  ;;  %v604_v41 = vld [vmem:[%s1562_s1 + $0x28] sm:$0xff] }
  0x17   : > { %s964_s25 = smul.u32 160, %s176_s24  ;;  %937 = vmatpush.msra.mxu1 %v607_v35  ;;  %939 = vmatpush.msra.mxu3 %v607_v35  ;;  %v603_v43 = vld [vmem:[%s1562_s1 + $0x20] sm:$0xff]  ;;  %v602_v44 = vld [vmem:[%s1562_s1 + $0x18] sm:$0xff]  ;;  %v601_v47 = vld [vmem:[%s1562_s1 + $0x10] sm:$0xff]  ;;  %vm533_vm7 = vcmask 523712   ;;  %vm582_vm8 = vcmask 589312  }
  0x18   : > { %641 = vmatpush.msra.mxu0 %v606_v37  ;;  %941 = vmatpush.msra.mxu2 %v606_v37  ;;  %v600_v48 = vld [vmem:[%s1562_s1 + $0x8] sm:$0xff]  ;;  %v599_v50 = vld [vmem:[%s1562_s1] sm:$0xff]  ;;  %vm608_vm9 = vcmask 588800  }
  0x19   : > { %s1196_s28 = scalar_lea.vmem %s1561_s0, %s964_s25  ;;  %940 = vmatpush.msra.mxu1 %v606_v37  ;;  %942 = vmatpush.msra.mxu3 %v606_v37 }
  0x1a   : > { %v1199_v0 = vld [vmem:[%s1196_s28 + $0x41] sm:$0xff]  ;;  %v1211_v3 = vld [vmem:[%s1196_s28 + $0x10] sm:$0xff]  ;;  %642 = vmatpush.msra.mxu0 %v605_v40  ;;  %944 = vmatpush.msra.mxu2 %v605_v40 }
  0x1b   : > { %v197_v1 = vld [vmem:[%s1196_s28 + $0x1] sm:$0xff]  ;;  %221 = vrot.lane.b32.xlu1 %v1199_v0, %s1114_s29  ;;  %v881_v5 = vld [vmem:[%s1196_s28 + $0x11] sm:$0xff]  ;;  %190 = vst.msk [vmem:[#allocation2 + $0x8] sm:$0xff] %vm188_vm0, %v1211_v3  ;;  %943 = vmatpush.msra.mxu1 %v605_v40 }
  0x1c   : > { %213 = vrot.lane.b32.xlu0 %v197_v1, %s1114_s29  ;;  %v1206_v2 = vld [vmem:[%s1196_s28 + $0x42] sm:$0xff]  ;;  %v1220_v6 = vld [vmem:[%s1196_s28 + $0x50] sm:$0xff]  ;;  %945 = vmatpush.msra.mxu3 %v605_v40 }
  0x1d   : > { %270 = vrot.lane.b32.xlu2 %v1206_v2, %s1115_s30  ;;  %v246_v4 = vld [vmem:[%s1196_s28 + $0x2] sm:$0xff]  ;;  %v889_v8 = vld [vmem:[%s1196_s28 + $0x12] sm:$0xff]  ;;  %194 = vst.msk [vmem:[#allocation2 + $0x28] sm:$0xff] %vm188_vm0, %v1220_v6  ;;  %643 = vmatpush.msra.mxu0 %v604_v41 }
  0x1e   : > { %v199_v7 = vld [vmem:[%s1196_s28 + $0x21] sm:$0xff]  ;;  %v1229_v9 = vld [vmem:[%s1196_s28 + $0x51] sm:$0xff]  ;;  %947 = vmatpush.msra.mxu2 %v604_v41  ;;  %946 = vmatpush.msra.mxu1 %v604_v41 }
  0x1f   : > { %v248_v10 = vld [vmem:[%s1196_s28 + $0x22] sm:$0xff]  ;;  %v875_v12 = vld [vmem:[%s1196_s28 + $0x30] sm:$0xff]  ;;  %644 = vmatpush.msra.mxu0 %v603_v43  ;;  %948 = vmatpush.msra.mxu3 %v604_v41 }
  0x20   : > { %v897_v11 = vld [vmem:[%s1196_s28 + $0x20] sm:$0xff]  ;;  %v1242_v14 = vld [vmem:[%s1196_s28 + $0x52] sm:$0xff]  ;;  %192 = vst.msk [vmem:[#allocation2 + $0x18] sm:$0xff] %vm188_vm0, %v875_v12  ;;  %950 = vmatpush.msra.mxu2 %v603_v43  ;;  %949 = vmatpush.msra.mxu1 %v603_v43 }
  0x21   : > { %v203_v13 = vld [vmem:[%s1196_s28 + $0x61] sm:$0xff]  ;;  %v1253_v16 = vld [vmem:[%s1196_s28 + $0x31] sm:$0xff]  ;;  %191 = vst.msk [vmem:[#allocation2 + $0x10] sm:$0xff] %vm188_vm0, %v897_v11  ;;  %645 = vmatpush.msra.mxu0 %v602_v44  ;;  %951 = vmatpush.msra.mxu3 %v603_v43 }
  0x22   : > { %v1247_v15 = vld [vmem:[%s1196_s28 + $0x62] sm:$0xff]  ;;  %v1262_v18 = vld [vmem:[%s1196_s28 + $0x32] sm:$0xff]  ;;  %953 = vmatpush.msra.mxu2 %v602_v44  ;;  %952 = vmatpush.msra.mxu1 %v602_v44 }
  0x23   : > { %312 = vrot.lane.b32.xlu1 %v1211_v3, %s1116_s4  ;;  %v901_v17 = vld [vmem:[%s1196_s28 + $0x60] sm:$0xff]  ;;  %v1265_v19 = vld [vmem:[%s1196_s28 + $0x70] sm:$0xff]  ;;  %646 = vmatpush.msra.mxu0 %v601_v47 }
  0x24   : > { %262 = vrot.lane.b32.xlu0 %v246_v4, %s1115_s30  ;;  %v1273_v20 = vld [vmem:[%s1196_s28 + $0x71] sm:$0xff]  ;;  %v899_v21 = vld [vmem:[%s1196_s28 + $0x40] sm:$0xff]  ;;  %195 = vst.msk [vmem:[#allocation2 + $0x30] sm:$0xff] %vm188_vm0, %v901_v17  ;;  %956 = vmatpush.msra.mxu2 %v601_v47 }
  0x25   : > { %361 = vrot.lane.b32.xlu2 %v881_v5, %s1117_s5  ;;  %v1286_v22 = vld [vmem:[%s1196_s28 + $0x72] sm:$0xff]  ;;  %193 = vst.msk [vmem:[#allocation2 + $0x20] sm:$0xff] %vm188_vm0, %v899_v21  ;;  %v180_v23 = vld [vmem:[%s1196_s28] sm:$0xff]  ;;  %647 = vmatpush.msra.mxu0 %v600_v48 }
  0x26   : > { %189 = vst.msk [vmem:[#allocation2] sm:$0xff] %vm188_vm0, %v180_v23  ;;  %v1300_v24 = vld [vmem:[%s1196_s28 + $0x80] sm:$0xff]  ;;  %954 = vmatpush.msra.mxu3 %v602_v44  ;;  %959 = vmatpush.msra.mxu2 %v600_v48  ;;  %v904_v56 = vld [vmem:[%s1196_s28 + $0x90] sm:$0xff] }
  0x27   : > { %196 = vst.msk [vmem:[#allocation2 + $0x38] sm:$0xff] %vm188_vm0, %v1265_v19  ;;  %v1319_v26 = vld [vmem:[%s1196_s28 + $0x81] sm:$0xff]  ;;  %648 = vmatpush.msra.mxu0 %v599_v50  ;;  %955 = vmatpush.msra.mxu1 %v601_v47  ;;  %v912_v58 = vld [vmem:[%s1196_s28 + $0x91] sm:$0xff] }
  0x28   : > { %v1327_v28 = vld [vmem:[%s1196_s28 + $0x82] sm:$0xff]  ;;  %957 = vmatpush.msra.mxu3 %v601_v47  ;;  %962 = vmatpush.msra.mxu2 %v599_v50  ;;  %v920_v61 = vld [vmem:[%s1196_s28 + $0x92] sm:$0xff]  ;;  %s1470_s28 = sand.u32 1, %s1104_s13  }
  0x29   : > { %958 = vmatpush.msra.mxu1 %v600_v48  ;;  %s737_s10 = scalar_lea.sflag [#allocation4], %s1470_s28 }
  0x2a   : > { %960 = vmatpush.msra.mxu3 %v600_v48 }
  0x2b   : > { %320 = vrot.lane.b32.xlu1 %v1220_v6, %s1116_s4  ;;  %961 = vmatpush.msra.mxu1 %v599_v50 }
  0x2c   : > { %217 = vrot.lane.b32.xlu0 %v199_v7, %s1114_s29  ;;  %963 = vmatpush.msra.mxu3 %v599_v50 }
  0x2d   : > { %410 = vrot.lane.b32.xlu2 %v889_v8, %s1118_s6 }
  0x33   : > { %369 = vrot.lane.b32.xlu1 %v1229_v9, %s1117_s5 }
  0x34   : > { %266 = vrot.lane.b32.xlu0 %v248_v10, %s1115_s30 }
  0x35   : > { %460 = vrot.lane.b32.xlu2 %v897_v11, %s1119_s7 }
  0x3b   : > { %316 = vrot.lane.b32.xlu1 %v875_v12, %s1116_s4 }
  0x3c   : > { %225 = vrot.lane.b32.xlu0 %v203_v13, %s1114_s29 }
  0x3d   : > { %418 = vrot.lane.b32.xlu2 %v1242_v14, %s1118_s6 }
  0x43   : > { %274 = vrot.lane.b32.xlu1 %v1247_v15, %s1115_s30 }
  0x44   : > { %509 = vrot.lane.b32.xlu0 %v199_v7, %s1120_s8 }
  0x45   : > { %365 = vrot.lane.b32.xlu2 %v1253_v16, %s1117_s5 }
  0x4b   : > { %558 = vrot.lane.b32.xlu1 %v248_v10, %s1121_s9 }
  0x4c   : > { %468 = vrot.lane.b32.xlu0 %v901_v17, %s1119_s7 }
  0x4d   : > { %215 = vrot.lane.b32.xlu2 %v881_v5, %s1114_s29 }
  0x53   : > { %414 = vrot.lane.b32.xlu1 %v1262_v18, %s1118_s6 }
  0x54   : > { %324 = vrot.lane.b32.xlu0 %v1265_v19, %s1116_s4 }
  0x55   : > { %517 = vrot.lane.b32.xlu2 %v203_v13, %s1120_s8 }
  0x5b   : > { %373 = vrot.lane.b32.xlu1 %v1273_v20, %s1117_s5 }
  0x5c   : > { %264 = vrot.lane.b32.xlu0 %v889_v8, %s1115_s30 }
  0x5d   : > { %464 = vrot.lane.b32.xlu2 %v899_v21, %s1119_s7 }
  0x63   : > { %223 = vrot.lane.b32.xlu1 %v1229_v9, %s1114_s29 }
  0x64   : > { %566 = vrot.lane.b32.xlu0 %v1247_v15, %s1121_s9 }
  0x65   : > { %314 = vrot.lane.b32.xlu2 %v897_v11, %s1116_s4 }
  0x6b   : > { %513 = vrot.lane.b32.xlu1 %v1199_v0, %s1120_s8 }
  0x6c   : > { %422 = vrot.lane.b32.xlu0 %v1286_v22, %s1118_s6 }
  0x6d   : > { %272 = vrot.lane.b32.xlu2 %v1242_v14, %s1115_s30 }
  0x73   : > { %472 = vrot.lane.b32.xlu1 %v1300_v24, %s1119_s7 }
  0x74   : > { %363 = vrot.lane.b32.xlu0 %v199_v7, %s1117_s5 }
  0x75   : > { %562 = vrot.lane.b32.xlu2 %v1206_v2, %s1121_s9 }
  0x77   : > { %v271_v25 = vpop.permute.xlu2 %270 }
  0x7b   : > { %322 = vrot.lane.b32.xlu1 %v901_v17, %s1116_s4 }
  0x7c   : > { %219 = vrot.lane.b32.xlu0 %v1253_v16, %s1114_s29 }
  0x7d   : > { %412 = vrot.lane.b32.xlu2 %v248_v10, %s1118_s6 }
  0x7f   : > { %v362_v27 = vpop.permute.xlu2 %361 }
  0x83   : > { %268 = vrot.lane.b32.xlu1 %v1262_v18, %s1115_s30 }
  0x84   : > { %521 = vrot.lane.b32.xlu0 %v1319_v26, %s1120_s8 }
  0x85   : > { %371 = vrot.lane.b32.xlu2 %v203_v13, %s1117_s5 }
  0x87   : > { %v411_v29 = vpop.permute.xlu2 %410 }
  0x8b   : > { %570 = vrot.lane.b32.xlu1 %v1327_v28, %s1121_s9 }
  0x8c   : > { %462 = vrot.lane.b32.xlu0 %v875_v12, %s1119_s7 }
  0x8d   : > { %v222_v30 = vpop.permute.xlu1 %221  ;;  %227 = vrot.lane.b32.xlu2 %v1273_v20, %s1114_s29 }
  0x8e   : > { %v214_v31 = vpop.permute.xlu0 %213  ;;  %242 = vst.msk [vmem:[#allocation2 + $0x20] sm:$0xff] %vm237_vm1, %v222_v30 }
  0x8f   : > { %238 = vst.msk [vmem:[#allocation2] sm:$0xff] %vm237_vm1, %v214_v31  ;;  %v461_v32 = vpop.permute.xlu2 %460 }
  0x90   : > { %291 = vst.msk [vmem:[#allocation2 + $0x20] sm:$0xff] %vm286_vm2, %v271_v25 }
  0x93   : > { %420 = vrot.lane.b32.xlu1 %v1247_v15, %s1118_s6 }
  0x94   : > { %318 = vrot.lane.b32.xlu0 %v899_v21, %s1116_s4 }
  0x95   : > { %v313_v33 = vpop.permute.xlu1 %312  ;;  %511 = vrot.lane.b32.xlu2 %v1253_v16, %s1120_s8 }
  0x96   : > { %v263_v34 = vpop.permute.xlu0 %262 }
  0x97   : > { %287 = vst.msk [vmem:[#allocation2] sm:$0xff] %vm286_vm2, %v263_v34  ;;  %v419_v36 = vpop.permute.xlu2 %418 }
  0x98   : > { %337 = vst.msk [vmem:[#allocation2] sm:$0xff] %vm336_vm3, %v313_v33 }
  0x99   : > { %386 = vst.msk [vmem:[#allocation2] sm:$0xff] %vm385_vm4, %v362_v27 }
  0x9a   : > { %435 = vst.msk [vmem:[#allocation2] sm:$0xff] %vm434_vm5, %v411_v29 }
  0x9b   : > { %485 = vst.msk [vmem:[#allocation2] sm:$0xff] %vm484_vm6, %v461_v32  ;;  %367 = vrot.lane.b32.xlu1 %v1199_v0, %s1117_s5 }
  0x9c   : > { %276 = vrot.lane.b32.xlu0 %v1286_v22, %s1115_s30 }
  0x9d   : > { %v321_v38 = vpop.permute.xlu1 %320  ;;  %470 = vrot.lane.b32.xlu2 %v1265_v19, %s1119_s7 }
  0x9e   : > { %v218_v39 = vpop.permute.xlu0 %217  ;;  %341 = vst.msk [vmem:[#allocation2 + $0x20] sm:$0xff] %vm336_vm3, %v321_v38 }
  0x9f   : > { %240 = vst.msk [vmem:[#allocation2 + $0x10] sm:$0xff] %vm237_vm1, %v218_v39  ;;  %v366_v42 = vpop.permute.xlu2 %365 }
  0xa3   : > { %326 = vrot.lane.b32.xlu1 %v1300_v24, %s1116_s4 }
  0xa4   : > { %560 = vrot.lane.b32.xlu0 %v1262_v18, %s1121_s9 }
  0xa5   : > { %v370_v45 = vpop.permute.xlu1 %369  ;;  %416 = vrot.lane.b32.xlu2 %v1206_v2, %s1118_s6 }
  0xa6   : > { %v267_v46 = vpop.permute.xlu0 %266  ;;  %390 = vst.msk [vmem:[#allocation2 + $0x20] sm:$0xff] %vm385_vm4, %v370_v45 }
  0xa7   : > { %289 = vst.msk [vmem:[#allocation2 + $0x10] sm:$0xff] %vm286_vm2, %v267_v46  ;;  %v216_v49 = vpop.permute.xlu2 %215 }
  0xa8   : > { %439 = vst.msk [vmem:[#allocation2 + $0x20] sm:$0xff] %vm434_vm5, %v419_v36 }
  0xa9   : > { %239 = vst.msk [vmem:[#allocation2 + $0x8] sm:$0xff] %vm237_vm1, %v216_v49 }
  0xab   : > { %375 = vrot.lane.b32.xlu1 %v1319_v26, %s1117_s5  ;;  %s870_s5 = sshll.u32 %s1470_s28, 6 }
  0xac   : > { %519 = vrot.lane.b32.xlu0 %v1273_v20, %s1120_s8 }
  0xad   : > { %v317_v51 = vpop.permute.xlu1 %316  ;;  %466 = vrot.lane.b32.xlu2 %v1220_v6, %s1119_s7 }
  0xae   : > { %v226_v52 = vpop.permute.xlu0 %225  ;;  %339 = vst.msk [vmem:[#allocation2 + $0x10] sm:$0xff] %vm336_vm3, %v317_v51 }
  0xaf   : > { %244 = vst.msk [vmem:[#allocation2 + $0x30] sm:$0xff] %vm237_vm1, %v226_v52  ;;  %v518_v53 = vpop.permute.xlu2 %517 }
  0xb0   : > { %388 = vst.msk [vmem:[#allocation2 + $0x10] sm:$0xff] %vm385_vm4, %v366_v42 }
  0xb3   : > { %424 = vrot.lane.b32.xlu1 %v1327_v28, %s1118_s6  ;;  %s1474_s6 = scalar_lea.vmem [#allocation3], %s870_s5 }
  0xb4   : > { %568 = vrot.lane.b32.xlu0 %v1286_v22, %s1121_s9  ;;  %s754_s27 = sshll.u32 %s1474_s6, 4  ;;  %s1507_s27 = int_to_ptr.vmem [resolvable:$true] %s754_s27 }
  0xb5   : > { %v275_v54 = vpop.permute.xlu1 %274  ;;  %515 = vrot.lane.b32.xlu2 %v1229_v9, %s1120_s8 }
  0xb6   : > { %v510_v55 = vpop.permute.xlu0 %509  ;;  %293 = vst.msk [vmem:[#allocation2 + $0x30] sm:$0xff] %vm286_vm2, %v275_v54 }
  0xb7   : > { %534 = vst.msk [vmem:[#allocation2] sm:$0xff] %vm533_vm7, %v510_v55  ;;  %v465_v57 = vpop.permute.xlu2 %464 }
  0xbb   : > { %564 = vrot.lane.b32.xlu1 %v1242_v14, %s1121_s9 }
  0xbc   : > { %474 = vrot.lane.b32.xlu0 %v904_v56, %s1119_s7  ;;  %s936_s7 = sshll.u32 %s1164_s16, 6 }
  0xbd   : > { %v559_v59 = vpop.permute.xlu1 %558  ;;  %523 = vrot.lane.b32.xlu2 %v912_v58, %s1120_s8  ;;  %s753_s26 = scalar_lea.hbm %s1563_s2, %s936_s7 }
  0xbe   : > { %v469_v60 = vpop.permute.xlu0 %468  ;;  %583 = vst.msk [vmem:[#allocation2] sm:$0xff] %vm582_vm8, %v559_v59  ;;  %s756_s30 = sshll.u32 %s753_s26, 4  ;;  %s757_s30 = int_to_ptr.hbm [resolvable:$true] %s756_s30 }
  0xbf   : > { %489 = vst.msk [vmem:[#allocation2 + $0x20] sm:$0xff] %vm484_vm6, %v469_v60  ;;  %v315_v62 = vpop.permute.xlu2 %314  ;;  %s1032_s11 = sshra.s32 %s757_s30, 4  ;;  %s1033_s11 = int_to_ptr.hbm [resolvable:$true] %s1032_s11 }
  0xc0   : > { %538 = vst.msk [vmem:[#allocation2 + $0x20] sm:$0xff] %vm533_vm7, %v518_v53  ;;  %s1034_s4 = scalar_lea.hbm %s1033_s11, 64  ;;  %p1039_p0 = scmp.lt.s32.totalorder %s1033_s11, %s1563_s2 }
  0xc1   : > { %p1035_p11 = scmp.ne.s32.totalorder %s1033_s11, %s1034_s4  ;;  %p1040_p1 = scmp.lt.s32.totalorder %s1038_s20, %s1034_s4 }
  0xc3   : > { %p1036_p12 = pnand %p1035_p11, %p1181_p5  ;;  %p1041_p2 = por %p1040_p1, %p1039_p0 }
  0xc4   : > { %572 = vrot.lane.b32.xlu0 %v920_v61, %s1121_s9 }
  0xc5   : > { %v415_v63 = vpop.permute.xlu1 %414  ;;  %v591_v1 = vld [vmem:[#allocation2] sm:$0xff]  ;;  %p1037_p13 = pneg %p1036_p12 }
  0xc6   : > { %v325_v0 = vpop.permute.xlu0 %324  ;;  %437 = vst.msk [vmem:[#allocation2 + $0x10] sm:$0xff] %vm434_vm5, %v415_v63  ;;  %921 = vmatmul.msk.f32.vlgmr.msra.gmra.mxu0 %vm608_vm9, %v591_v1 }
  0xc7   : > { %343 = vst.msk [vmem:[#allocation2 + $0x30] sm:$0xff] %vm336_vm3, %v325_v0  ;;  %v273_v2 = vpop.permute.xlu2 %272  ;;  %p1042_p3 = pnand %p1041_p2, %p1037_p13 }
  0xc8   : > { %487 = vst.msk [vmem:[#allocation2 + $0x10] sm:$0xff] %vm484_vm6, %v465_v57 }
  0xcd   : > { %v374_v3 = vpop.permute.xlu1 %373 }
  0xce   : > { %v265_v4 = vpop.permute.xlu0 %264  ;;  %392 = vst.msk [vmem:[#allocation2 + $0x30] sm:$0xff] %vm385_vm4, %v374_v3 }
  0xcf   : > { %288 = vst.msk [vmem:[#allocation2 + $0x8] sm:$0xff] %vm286_vm2, %v265_v4  ;;  %v563_v5 = vpop.permute.xlu2 %562 }
  0xd0   : > { %338 = vst.msk [vmem:[#allocation2 + $0x8] sm:$0xff] %vm336_vm3, %v315_v62 }
  0xd5   : > { %v224_v6 = vpop.permute.xlu1 %223 }
  0xd6   : > { %v567_v7 = vpop.permute.xlu0 %566  ;;  %243 = vst.msk [vmem:[#allocation2 + $0x28] sm:$0xff] %vm237_vm1, %v224_v6 }
  0xd7   : > { %587 = vst.msk [vmem:[#allocation2 + $0x20] sm:$0xff] %vm582_vm8, %v567_v7  ;;  %v413_v8 = vpop.permute.xlu2 %412 }
  0xd8   : > { %292 = vst.msk [vmem:[#allocation2 + $0x28] sm:$0xff] %vm286_vm2, %v273_v2 }
  0xdd   : > { %v514_v9 = vpop.permute.xlu1 %513 }
  0xde   : > { %v423_v10 = vpop.permute.xlu0 %422  ;;  %536 = vst.msk [vmem:[#allocation2 + $0x10] sm:$0xff] %vm533_vm7, %v514_v9  ;;  %v595_v11 = vld [vmem:[#allocation2 + $0x20] sm:$0xff] }
  0xdf   : > { %441 = vst.msk [vmem:[#allocation2 + $0x30] sm:$0xff] %vm434_vm5, %v423_v10  ;;  %925 = vmatmul.msk.f32.vlgmr.msra.gmra.mxu2 %vm608_vm9, %v595_v11  ;;  %v372_v12 = vpop.permute.xlu2 %371 }
  0xe0   : > { %585 = vst.msk [vmem:[#allocation2 + $0x10] sm:$0xff] %vm582_vm8, %v563_v5 }
  0xe5   : > { %v473_v13 = vpop.permute.xlu1 %472 }
  0xe6   : > { %v364_v14 = vpop.permute.xlu0 %363  ;;  %491 = vst.msk [vmem:[#allocation2 + $0x30] sm:$0xff] %vm484_vm6, %v473_v13 }
  0xe7   : > { %387 = vst.msk [vmem:[#allocation2 + $0x8] sm:$0xff] %vm385_vm4, %v364_v14  ;;  %v593_v15 = vld [vmem:[#allocation2 + $0x10] sm:$0xff]  ;;  %v228_v16 = vpop.permute.xlu2 %227 }
  0xe8   : > { %436 = vst.msk [vmem:[#allocation2 + $0x8] sm:$0xff] %vm434_vm5, %v413_v8  ;;  %923 = vmatmul.msk.f32.vlgmr.msra.gmra.mxu1 %vm608_vm9, %v593_v15 }
  0xe9   : > { %245 = vst.msk [vmem:[#allocation2 + $0x38] sm:$0xff] %vm237_vm1, %v228_v16 }
  0xed   : > { %v323_v17 = vpop.permute.xlu1 %322 }
  0xee   : > { %v220_v18 = vpop.permute.xlu0 %219  ;;  %342 = vst.msk [vmem:[#allocation2 + $0x28] sm:$0xff] %vm336_vm3, %v323_v17 }
  0xef   : > { %241 = vst.msk [vmem:[#allocation2 + $0x18] sm:$0xff] %vm237_vm1, %v220_v18  ;;  %v512_v19 = vpop.permute.xlu2 %511 }
  0xf0   : > { %391 = vst.msk [vmem:[#allocation2 + $0x28] sm:$0xff] %vm385_vm4, %v372_v12 }
  0xf5   : > { %v269_v20 = vpop.permute.xlu1 %268 }
  0xf6   : > { %v522_v21 = vpop.permute.xlu0 %521  ;;  %290 = vst.msk [vmem:[#allocation2 + $0x18] sm:$0xff] %vm286_vm2, %v269_v20 }
  0xf7   : > { %540 = vst.msk [vmem:[#allocation2 + $0x30] sm:$0xff] %vm533_vm7, %v522_v21  ;;  %v471_v22 = vpop.permute.xlu2 %470 }
  0xfd   : > { %v571_v23 = vpop.permute.xlu1 %570 }
  0xfe   : > { %v463_v24 = vpop.permute.xlu0 %462  ;;  %589 = vst.msk [vmem:[#allocation2 + $0x30] sm:$0xff] %vm582_vm8, %v571_v23 }
  0xff   : > { %486 = vst.msk [vmem:[#allocation2 + $0x8] sm:$0xff] %vm484_vm6, %v463_v24  ;;  %v417_v25 = vpop.permute.xlu2 %416 }
 0x100   : > { %535 = vst.msk [vmem:[#allocation2 + $0x8] sm:$0xff] %vm533_vm7, %v512_v19 }
 0x105   : > { %v421_v26 = vpop.permute.xlu1 %420  ;;  %v597_v28 = vld [vmem:[#allocation2 + $0x30] sm:$0xff] }
 0x106   : > { %v319_v27 = vpop.permute.xlu0 %318  ;;  %440 = vst.msk [vmem:[#allocation2 + $0x28] sm:$0xff] %vm434_vm5, %v421_v26  ;;  %927 = vmatmul.msk.f32.vlgmr.msra.gmra.mxu3 %vm608_vm9, %v597_v28 }
 0x107   : > { %340 = vst.msk [vmem:[#allocation2 + $0x18] sm:$0xff] %vm336_vm3, %v319_v27  ;;  %v467_v29 = vpop.permute.xlu2 %466 }
 0x108   : > { %490 = vst.msk [vmem:[#allocation2 + $0x28] sm:$0xff] %vm484_vm6, %v471_v22 }
 0x10d   : > { %v368_v30 = vpop.permute.xlu1 %367 }
 0x10e   : > { %v277_v31 = vpop.permute.xlu0 %276  ;;  %389 = vst.msk [vmem:[#allocation2 + $0x18] sm:$0xff] %vm385_vm4, %v368_v30 }
 0x10f   : > { %294 = vst.msk [vmem:[#allocation2 + $0x38] sm:$0xff] %vm286_vm2, %v277_v31  ;;  %v516_v32 = vpop.permute.xlu2 %515 }
 0x110   : > { %438 = vst.msk [vmem:[#allocation2 + $0x18] sm:$0xff] %vm434_vm5, %v417_v25 }
 0x111   : > { %488 = vst.msk [vmem:[#allocation2 + $0x18] sm:$0xff] %vm484_vm6, %v467_v29 }
 0x112   : > { %537 = vst.msk [vmem:[#allocation2 + $0x18] sm:$0xff] %vm533_vm7, %v516_v32 }
 0x115   : > { %v327_v33 = vpop.permute.xlu1 %326 }
 0x116   : > { %v561_v34 = vpop.permute.xlu0 %560  ;;  %344 = vst.msk [vmem:[#allocation2 + $0x38] sm:$0xff] %vm336_vm3, %v327_v33 }
 0x117   : > { %584 = vst.msk [vmem:[#allocation2 + $0x8] sm:$0xff] %vm582_vm8, %v561_v34  ;;  %v524_v40 = vpop.permute.xlu2 %523 }
 0x11d   : > { %v376_v35 = vpop.permute.xlu1 %375 }
 0x11e   : > { %v520_v36 = vpop.permute.xlu0 %519  ;;  %393 = vst.msk [vmem:[#allocation2 + $0x38] sm:$0xff] %vm385_vm4, %v376_v35  ;;  %v592_v37 = vld [vmem:[#allocation2 + $0x8] sm:$0xff] }
 0x11f   : > { %539 = vst.msk [vmem:[#allocation2 + $0x28] sm:$0xff] %vm533_vm7, %v520_v36  ;;  %922 = vmatmul.msk.f32.gmra.mxu0 %vm608_vm9, %v592_v37 }
 0x125   : > { %v425_v38 = vpop.permute.xlu1 %424 }
 0x126   : > { %v569_v39 = vpop.permute.xlu0 %568  ;;  %442 = vst.msk [vmem:[#allocation2 + $0x38] sm:$0xff] %vm434_vm5, %v425_v38 }
 0x127   : > { %588 = vst.msk [vmem:[#allocation2 + $0x28] sm:$0xff] %vm582_vm8, %v569_v39 }
 0x12d   : > { %v565_v41 = vpop.permute.xlu1 %564 }
 0x12e   : > { %v475_v42 = vpop.permute.xlu0 %474  ;;  %586 = vst.msk [vmem:[#allocation2 + $0x18] sm:$0xff] %vm582_vm8, %v565_v41  ;;  %v596_v43 = vld [vmem:[#allocation2 + $0x28] sm:$0xff] }
 0x12f   : > { %492 = vst.msk [vmem:[#allocation2 + $0x38] sm:$0xff] %vm484_vm6, %v475_v42  ;;  %926 = vmatmul.msk.f32.gmra.mxu2 %vm608_vm9, %v596_v43 }
 0x130   : > { %541 = vst.msk [vmem:[#allocation2 + $0x38] sm:$0xff] %vm533_vm7, %v524_v40 }
 0x135   : > { %v594_v45 = vld [vmem:[#allocation2 + $0x18] sm:$0xff] }
 0x136   : > { %v573_v44 = vpop.permute.xlu0 %572  ;;  %924 = vmatmul.msk.f32.gmra.mxu1 %vm608_vm9, %v594_v45 }
 0x137   : > { %590 = vst.msk [vmem:[#allocation2 + $0x38] sm:$0xff] %vm582_vm8, %v573_v44 }
 0x13e   : > { %v598_v46 = vld [vmem:[#allocation2 + $0x38] sm:$0xff] }
 0x13f   : > { %928 = vmatmul.msk.f32.gmra.mxu3 %vm608_vm9, %v598_v46 }
 0x143   : > { %v650_v47 = vpop.f32.mrf.mxu0 }
 0x144   : > { %674 = vst.msk [vmem:[%s1474_s6] sm:$0xff] %vm188_vm0, %v650_v47  ;;  %v703_v53 = vmul.f32 %v650_v47, %v650_v47  ;;  %v682_v55 = vsel %vm188_vm0, %v650_v47, 0.0 }
 0x146   : > { %v711_v58 = vsel %vm188_vm0, %v703_v53, 0.0 }
 0x162   : > { %v662_v48 = vpop.f32.mrf.mxu2 }
 0x163   : > { %678 = vst.msk [vmem:[%s1474_s6 + $0x20] sm:$0xff] %vm188_vm0, %v662_v48  ;;  %v707_v6 = vmul.f32 %v662_v48, %v662_v48  ;;  %v689_v9 = vsel %vm188_vm0, %v662_v48, 0.0 }
 0x165   : > { %v656_v49 = vpop.f32.mrf.mxu1  ;;  %v718_v11 = vsel %vm188_vm0, %v707_v6, 0.0 }
 0x166   : > { %676 = vst.msk [vmem:[%s1474_s6 + $0x10] sm:$0xff] %vm188_vm0, %v656_v49  ;;  %v705_v59 = vmul.f32 %v656_v49, %v656_v49  ;;  %v685_v61 = vsel %vm188_vm0, %v656_v49, 0.0 }
 0x168   : > { %v714_v1 = vsel %vm188_vm0, %v705_v59, 0.0 }
 0x189   : > { %v668_v50 = vpop.f32.mrf.mxu3 }
 0x18a   : > { %680 = vst.msk [vmem:[%s1474_s6 + $0x30] sm:$0xff] %vm188_vm0, %v668_v50  ;;  %v709_v16 = vmul.f32 %v668_v50, %v668_v50  ;;  %v693_v19 = vsel %vm188_vm0, %v668_v50, 0.0 }
 0x18c   : > { %v722_v22 = vsel %vm188_vm0, %v709_v16, 0.0 }
 0x19c   : > { %v653_v51 = vpop.f32.mrf.mxu0 }
 0x19d   : > { %675 = vst.msk [vmem:[%s1474_s6 + $0x8] sm:$0xff] %vm188_vm0, %v653_v51  ;;  %v704_v52 = vmul.f32 %v653_v51, %v653_v51  ;;  %v683_v54 = vsel %vm188_vm0, %v653_v51, 0.0 }
 0x19e   : > { %v684_v57 = vadd.f32 %v683_v54, %v682_v55 }
 0x19f   : > { %v712_v56 = vsel %vm188_vm0, %v704_v52, 0.0 }
 0x1a0   : > { %v713_v60 = vadd.f32 %v712_v56, %v711_v58  ;;  %v686_v0 = vadd.f32 %v685_v61, %v684_v57 }
 0x1a2   : > { %v715_v5 = vadd.f32 %v714_v1, %v713_v60 }
 0x1b2   : > { %v665_v62 = vpop.f32.mrf.mxu2 }
 0x1b3   : > { %679 = vst.msk [vmem:[%s1474_s6 + $0x28] sm:$0xff] %vm188_vm0, %v665_v62  ;;  %v659_v63 = vpop.f32.mrf.mxu1  ;;  %v708_v12 = vmul.f32 %v665_v62, %v665_v62  ;;  %v691_v14 = vsel %vm188_vm0, %v665_v62, 0.0 }
 0x1b4   : > { %677 = vst.msk [vmem:[%s1474_s6 + $0x18] sm:$0xff] %vm188_vm0, %v659_v63  ;;  %v687_v2 = vsel %vm188_vm0, %v659_v63, 0.0  ;;  %v706_v3 = vmul.f32 %v659_v63, %v659_v63 }
 0x1b5   : > { %v688_v4 = vadd.f32 %v687_v2, %v686_v0  ;;  %v720_v17 = vsel %vm188_vm0, %v708_v12, 0.0 }
 0x1b6   : > { %v716_v7 = vsel %vm188_vm0, %v706_v3, 0.0 }
 0x1b7   : > { %v717_v8 = vadd.f32 %v716_v7, %v715_v5  ;;  %v690_v10 = vadd.f32 %v689_v9, %v688_v4 }
 0x1b9   : > { %v719_v13 = vadd.f32 %v718_v11, %v717_v8  ;;  %v692_v15 = vadd.f32 %v691_v14, %v690_v10 }
 0x1bb   : > { %v721_v18 = vadd.f32 %v720_v17, %v719_v13  ;;  %v694_v21 = vadd.f32 %v693_v19, %v692_v15 }
 0x1bd   : > { %v723_v26 = vadd.f32 %v722_v22, %v721_v18 }
 0x1c2   : > { %v671_v20 = vpop.f32.mrf.mxu3 }
 0x1c3   : > { %681 = vst.msk [vmem:[%s1474_s6 + $0x38] sm:$0xff] %vm188_vm0, %v671_v20  ;;  %v695_v23 = vsel %vm188_vm0, %v671_v20, 0.0  ;;  %v710_v24 = vmul.f32 %v671_v20, %v671_v20 }
 0x1c4   : > { %v696_v25 = vadd.f32 %v695_v23, %v694_v21 }
 0x1c5   : > { %1045 = shalt.err (!%p1042_p3)
}
 0x1c6   : > { %s1122_s5 = smov 128   ;;  %v724_v27 = vsel %vm188_vm0, %v710_v24, 0.0  ;;  %v697_v28 = vrot.slane %v696_v25, 4  ;;  %s871_s6 = sshll.u32 %s1470_s28, 1  ;;  %vm732_vm10 = vcmask 1040384   ;;  %vm734_vm11 = vcmask 58368  }
 0x1c7   : > { %965 = dma.vmem_to_hbm [thread:$0]  (%p1181_p5), %s1507_s27, 1024, %s757_s30, %s737_s10, %s1122_s5, %s1122_s5, %s1114_s29   ;;  %v725_v29 = vadd.f32 %v724_v27, %v723_v26 }
 0x1c8   : > { %v698_v30 = vadd.f32 %v697_v28, %v696_v25  ;;  %s933_s7 = sshll.u32 %s1164_s16, 1  ;;  %s174_s29 = scalar_lea.vmem [#allocation5], %s871_s6 }
 0x1c9   : > { %v726_v31 = vrot.slane %v725_v29, 4  ;;  %s769_s26 = scalar_lea.hbm %s1564_s3, %s933_s7  ;;  %s771_s27 = sshll.u32 %s174_s29, 4  ;;  %s772_s27 = int_to_ptr.vmem [resolvable:$true] %s771_s27 }
 0x1ca   : > { %v699_v32 = vrot.slane %v698_v30, 2  ;;  %s773_s30 = sshll.u32 %s769_s26, 4  ;;  %s742_s16 = scalar_lea.sflag [#allocation6], %s1470_s28  ;;  %s774_s30 = int_to_ptr.hbm [resolvable:$true] %s773_s30 }
 0x1cb   : > { %v727_v33 = vadd.f32 %v726_v31, %v725_v29  ;;  %s1060_s10 = sshra.s32 %s774_s30, 4  ;;  %s1066_s19 = scalar_lea.hbm %s1564_s3, 4  ;;  %s1061_s10 = int_to_ptr.hbm [resolvable:$true] %s1060_s10 }
 0x1cc   : > { %v700_v34 = vadd.f32 %v699_v32, %v698_v30  ;;  %s1062_s11 = scalar_lea.hbm %s1061_s10, 2  ;;  %p1067_p9 = scmp.lt.s32.totalorder %s1061_s10, %s1564_s3 }
 0x1cd   : > { %v728_v35 = vrot.slane %v727_v33, 2  ;;  %p1063_p4 = scmp.ne.s32.totalorder %s1061_s10, %s1062_s11  ;;  %p1068_p10 = scmp.lt.s32.totalorder %s1066_s19, %s1062_s11 }
 0x1ce   : > { %v701_v36 = vrot.slane %v700_v34, 1 }
 0x1cf   : > { %v729_v37 = vadd.f32 %v728_v35, %v727_v33  ;;  %p1064_p7 = pnand %p1063_p4, %p1181_p5  ;;  %p1069_p11 = por %p1068_p10, %p1067_p9 }
 0x1d0   : > { %v702_v39 = vadd.f32 %v701_v36, %v700_v34 }
 0x1d1   : > { %v730_v38 = vrot.slane %v729_v37, 1  ;;  %p1065_p8 = pneg %p1064_p7 }
 0x1d3   : > { %v731_v40 = vadd.f32 %v730_v38, %v729_v37  ;;  %p1070_p12 = pnand %p1069_p11, %p1065_p8 }
 0x1d5   : > { %v733_v41 = vsel %vm732_vm10, %v702_v39, %v731_v40 }
 0x1d6   : > { %735 = vst.msk [vmem:[%s174_s29] sm:$0x3] %vm734_vm11, %v733_v41 }
 0x1d7   : > { %1073 = shalt.err (!%p1070_p12)
}
 0x1d8   : > { %966 = dma.vmem_to_hbm [thread:$0]  (%p1181_p5), %s772_s27, 32, %s774_s30, %s742_s16  }
 0x1d9 PF: > { %p976_p13 = scmp.ge.s32.totalorder %s1112_s15, 2  ;;  %s785_s28 = sand.u32 1, %s1100_s12  }
 0x1da   : > { %s786_s25 = scalar_lea.sflag [#allocation4], %s785_s28 }
 0x1db   : > { %p970_p0 = pnand %p976_p13, %p1185_p6 }
 0x1dd   : > { %p971_p1 = pneg %p970_p0 }
 0x1df   : > { %1091 = dma.done.wait (%p971_p1), %s786_s25, 1024  }
 0x1e0   : > { %1093 = vsyncadd (%p971_p1), %s786_s25, 4294966272  ;;  %s796_s5 = scalar_lea.sflag [#allocation6], %s785_s28 }
 0x1e1   : > { %1095 = dma.done.wait (%p971_p1), %s796_s5, 32  }
 0x1e2   : > { %1097 = vsyncadd (%p971_p1), %s796_s5, 4294967264  ;;  %p17_p5 = scmp.ge.s32.totalorder %s1168_s18, 4   ;;  %s1567_s12 = smov %s1104_s13 }
 0x1e3   : > { %s1568_s13 = smov %s1108_s14  ;;  %s1569_s14 = smov %s1179_s21 }
 0x1e4   : > { %s1570_s15 = smov %s1168_s18  ;;  %19 = sbr.rel (!%p17_p5) target bundleno = 5 (0x5), region = 82 }
 0x1e9   :  { %802 = vsyncpa [#allocation4], 1 }
 0x1ea   :  { %804 = vsyncpa [#allocation4 + $0x1], 1 }
 0x1eb   :  { %805 = vsyncpa [#allocation6], 1 }
 0x1ec   :  { %807 = vsyncpa [#allocation6 + $0x1], 1 }

</bundles_post_ra>
